<compile_context>
chip_gen: v7x
topology: tpu7x:2x2x1
jax: 0.10.0
libtpu: 0.0.40
codegen_flags: <defaults>
</compile_context>

<pallas_src>
import functools

import jax
import jax.numpy as jnp
from jax.experimental import pallas as pl
from jax.experimental.pallas import tpu as pltpu

LANE = 128


def _round_up(x, m):
    return ((x + m - 1) // m) * m


def _choose_block_batch(B, H, target_rows=256):
    """BB samples per grid step: aim for BB*H ~ target_rows MXU rows, but keep
    at least 2 grid steps when B >= 2 (v7x has 2 TensorCores; a grid of 1 would
    idle one of them)."""
    bb = max(1, min(target_rows // max(H, 1), B))
    if B >= 2:
        bb = max(1, min(bb, B // 2))
    while B % bb:
        bb -= 1
    return bb


# -----------------------------------------------------------------------------
# Fused kernel: conv3x3+bias+ReLU -> global-avg-pool -> fc -> Linear/ReLU/Linear
# One grid step = BB batch elements.
# -----------------------------------------------------------------------------
def _fused_bbox_kernel(x_ref, wband_ref, bconv_ref, wfc_ref, bfc_ref,
                       w1_ref, b1_ref, w2_ref, b2_ref, o_ref):
    # x_ref:     [BB, H, KH*WpC_pad]   bf16, tap-concatenated padded input rows
    # wband_ref: [KH*WpC_pad, WCout_p] bf16, banded/merged conv weights
    # bconv_ref: [1, WCout_p]          f32, conv bias tiled over W
    # wfc_ref:   [WCout_p, F_pad]      f32, backbone fc tiled over W, / (H*W)
    # w1/w2:     [F_pad, Hid_pad], [Hid_pad, O_pad]  (zero-padded to 128 lanes)
    # o_ref:     [1, BB, O_pad]
    bb, h, k = x_ref.shape
    wcout = wband_ref.shape[1]

    # 3x3 conv as ONE lane-dense MXU matmul (all dh/dw/cin taps encoded in the
    # banded weight matrix), bf16 operands, f32 accumulation.
    x = x_ref[...].reshape(bb * h, k)
    acc = jnp.dot(x, wband_ref[...],
                  preferred_element_type=jnp.float32)          # [bb*h, wcout]
    feat = jnp.maximum(acc + bconv_ref[...], 0.0)               # conv+bias+ReLU

    # Global average pool folded into the backbone fc:
    #   mean_hw(feat) @ w_fc == (sum_h,w feat) @ (w_fc tiled / (H*W))
    s = feat.reshape(bb, h, wcout).sum(axis=1)                  # [bb, wcout]
    ftrs = jnp.dot(s, wfc_ref[...],
                   preferred_element_type=jnp.float32) + bfc_ref[...]   # [bb, F_pad]

    # Head: Linear(num_ftrs, 100) -> ReLU -> Linear(100, 4)  (all 128-padded)
    h1 = jnp.maximum(jnp.dot(ftrs, w1_ref[...],
                             preferred_element_type=jnp.float32) + b1_ref[...], 0.0)
    # TODO(synk): dropout (dropout_rate truthy) + second ReLU would go here.
    out = jnp.dot(h1, w2_ref[...],
                  preferred_element_type=jnp.float32) + b2_ref[...]     # [bb, O_pad]
    o_ref[0] = out


# -----------------------------------------------------------------------------
# Parameter preparation (one-time, outside jit): merged+lane-padded banded conv
# weights (bf16), tiled bias, pool-folded fc, 128-lane-padded head weights.
# All padding is zeros.
# -----------------------------------------------------------------------------
def prepare_kernel_params(params, H, W):
    w_conv = params["w_conv"].astype(jnp.float32)     # [Cout, Cin, KH, KW]
    b_conv = params["b_conv"].astype(jnp.float32)     # [Cout]
    w_fc, b_fc = params["w_fc"], params["b_fc"]       # [Cout, F], [1, F]
    w1, b1 = params["w1"], params["b1"]               # [F, Hid], [1, Hid]
    w2, b2 = params["w2"], params["b2"]               # [Hid, Out]

    Cout, Cin, KH, KW = w_conv.shape
    F, Hid, Out = w_fc.shape[1], w1.shape[1], w2.shape[1]
    Wp = W + KW - 1                                   # padded width (pad=1)
    WpC = Wp * Cin
    WpC_pad = _round_up(WpC, LANE)                    # lane-dense per-tap width
    WCout = W * Cout
    WCout_pad = _round_up(WCout, LANE)
    F_pad = _round_up(F, LANE)
    Hid_pad = _round_up(Hid, LANE)
    O_pad = _round_up(Out, LANE)

    # band[kh, wp*Cin + c, w*Cout + co] = w_conv[co, c, kh, wp - w] on the band.
    w_k = jnp.transpose(w_conv, (2, 3, 1, 0))         # [KH, KW, Cin, Cout]
    wp_i = jnp.arange(Wp)[None, :, None]
    w_i = jnp.arange(W)[None, None, :]
    dw_i = jnp.arange(KW)[:, None, None]
    shift = (wp_i == w_i + dw_i).astype(jnp.float32)  # [KW, Wp, W]
    band = jnp.einsum("apw,kacf->kpcwf", shift, w_k)  # [KH, Wp, Cin, W, Cout]
    band = band.reshape(KH, WpC, WCout)
    # Lane-pad both the contraction dim (per tap) and the output dim, then merge
    # the KH taps into a single [KH*WpC_pad, WCout_pad] matmul RHS (bf16).
    band = jnp.pad(band, ((0, 0), (0, WpC_pad - WpC), (0, WCout_pad - WCout)))
    band = band.reshape(KH * WpC_pad, WCout_pad).astype(jnp.bfloat16)

    bconv_t = jnp.pad(jnp.tile(b_conv, W).reshape(1, WCout),
                      ((0, 0), (0, WCout_pad - WCout)))          # bias tiled over W

    # Backbone fc, tiled over W and pre-scaled by 1/(H*W) (folds the avg-pool).
    wfc_e = jnp.tile(w_fc.astype(jnp.float32), (W, 1)) * (1.0 / (H * W))
    wfc_e = jnp.pad(wfc_e, ((0, WCout_pad - WCout), (0, F_pad - F)))
    bfc_p = jnp.pad(b_fc.astype(jnp.float32), ((0, 0), (0, F_pad - F)))

    w1_p = jnp.pad(w1.astype(jnp.float32), ((0, F_pad - F), (0, Hid_pad - Hid)))
    b1_p = jnp.pad(b1.astype(jnp.float32), ((0, 0), (0, Hid_pad - Hid)))
    w2_p = jnp.pad(w2.astype(jnp.float32), ((0, Hid_pad - Hid), (0, O_pad - Out)))
    b2_p = jnp.pad(b2.astype(jnp.float32), ((0, 0), (0, O_pad - Out)))

    return {"w_band": band, "b_conv_t": bconv_t,
            "w_fc_e": wfc_e, "b_fc_p": bfc_p,
            "w1_p": w1_p, "b1_p": b1_p, "w2_p": w2_p, "b2_p": b2_p,
            "out_dim": Out, "H": H, "W": W, "Cin": Cin, "KH": KH, "KW": KW,
            "WpC_pad": WpC_pad}


# -----------------------------------------------------------------------------
# Forward wrapper (jit-able)
# -----------------------------------------------------------------------------
def bounding_box_cnn_forward(x_nchw, kparams):
    B, C, H, W = x_nchw.shape
    # Guard against silently using params prepared for a different geometry
    # (the 1/(H*W) pool scale and the band are baked in at prep time).
    assert (H, W, C) == (kparams["H"], kparams["W"], kparams["Cin"]), \
        "kernel params prepared for a different input shape"
    KH, KW = kparams["KH"], kparams["KW"]
    WpC_pad = kparams["WpC_pad"]
    K = KH * WpC_pad
    WCout_pad = kparams["w_band"].shape[1]
    F_pad = kparams["w_fc_e"].shape[1]
    Hid_pad = kparams["w1_p"].shape[1]
    O_pad = kparams["w2_p"].shape[1]
    out_dim = kparams["out_dim"]
    Hp, Wp = H + KH - 1, W + KW - 1
    WpC = Wp * C

    # Glue: zero-pad spatial dims (conv padding=1), lay rows out lane-dense and
    # concatenate the KH row taps so the conv is a single matmul per grid step.
    xp = jnp.pad(x_nchw, ((0, 0), (0, 0), (1, 1), (1, 1)))            # [B,C,Hp,Wp]
    x_rows = jnp.transpose(xp, (0, 2, 3, 1)).reshape(B, Hp, WpC)
    x_rows = jnp.pad(x_rows, ((0, 0), (0, 0), (0, WpC_pad - WpC)))    # 128-lane pad
    x_taps = jnp.concatenate([x_rows[:, dh:dh + H, :] for dh in range(KH)],
                             axis=-1).astype(jnp.bfloat16)            # [B, H, K]

    BB = _choose_block_batch(B, H)
    G = B // BB

    flops = 2 * B * (H * K * WCout_pad + WCout_pad * F_pad
                     + F_pad * Hid_pad + Hid_pad * O_pad)
    bytes_accessed = (2 * (x_taps.size + kparams["w_band"].size)   # bf16 operands
                      + 4 * (kparams["b_conv_t"].size + kparams["w_fc_e"].size
                             + kparams["b_fc_p"].size + kparams["w1_p"].size
                             + kparams["b1_p"].size + kparams["w2_p"].size
                             + kparams["b2_p"].size + B * O_pad))

    out_pad = pl.pallas_call(
        _fused_bbox_kernel,
        out_shape=jax.ShapeDtypeStruct((G, BB, O_pad), jnp.float32),
        grid=(G,),
        in_specs=[
            pl.BlockSpec((BB, H, K), lambda g: (g, 0, 0)),            # BB samples/step
            pl.BlockSpec((K, WCout_pad), lambda g: (0, 0)),           # merged conv band
            pl.BlockSpec((1, WCout_pad), lambda g: (0, 0)),
            pl.BlockSpec((WCout_pad, F_pad), lambda g: (0, 0)),
            pl.BlockSpec((1, F_pad), lambda g: (0, 0)),
            pl.BlockSpec((F_pad, Hid_pad), lambda g: (0, 0)),
            pl.BlockSpec((1, Hid_pad), lambda g: (0, 0)),
            pl.BlockSpec((Hid_pad, O_pad), lambda g: (0, 0)),
            pl.BlockSpec((1, O_pad), lambda g: (0, 0)),
        ],
        out_specs=pl.BlockSpec((1, BB, O_pad), lambda g: (g, 0, 0)),
        compiler_params=pltpu.CompilerParams(
            dimension_semantics=("parallel",),        # v7x: shard steps over 2 TCs
            vmem_limit_bytes=32 * 1024 * 1024),
        cost_estimate=pl.CostEstimate(flops=flops, transcendentals=0,
                                      bytes_accessed=bytes_accessed),
    )(x_taps, kparams["w_band"], kparams["b_conv_t"],
      kparams["w_fc_e"], kparams["b_fc_p"],
      kparams["w1_p"], kparams["b1_p"], kparams["w2_p"], kparams["b2_p"])

    return out_pad.reshape(B, O_pad)[:, :out_dim]                     # [B, 4]


# -----------------------------------------------------------------------------
# Deterministic parameters (PyTorch-layout) + pure-JAX reference
# -----------------------------------------------------------------------------
def make_params(key, c_in=4, c_conv=8, num_ftrs=32, hidden=100):
    ks = jax.random.split(key, 7)
    scale = 0.1
    return {
        # synthetic backbone
        "w_conv": scale * jax.random.normal(ks[0], (c_conv, c_in, 3, 3), jnp.float32),
        "b_conv": scale * jax.random.normal(ks[1], (c_conv,), jnp.float32),
        "w_fc":   scale * jax.random.normal(ks[2], (c_conv, num_ftrs), jnp.float32),
        "b_fc":   scale * jax.random.normal(ks[3], (1, num_ftrs), jnp.float32),
        # head: Linear(num_ftrs, 100) -> ReLU -> Linear(100, 4)
        "w1": scale * jax.random.normal(ks[4], (num_ftrs, hidden), jnp.float32),
        "b1": jnp.zeros((1, hidden), jnp.float32),
        "w2": scale * jax.random.normal(ks[5], (hidden, 4), jnp.float32),
        "b2": jnp.zeros((1, 4), jnp.float32),
    }


def reference_forward(x_nchw, params):
    feat = jax.lax.conv_general_dilated(
        x_nchw, params["w_conv"], window_strides=(1, 1), padding="SAME",
        dimension_numbers=("NCHW", "OIHW", "NCHW"))
    feat = jnp.maximum(feat + params["b_conv"][None, :, None, None], 0.0)
    pooled = feat.mean(axis=(2, 3))                                   # [B, Cout]
    ftrs = pooled @ params["w_fc"] + params["b_fc"]
    h1 = jnp.maximum(ftrs @ params["w1"] + params["b1"], 0.0)
    return h1 @ params["w2"] + params["b2"]


if __name__ == "__main__":
    key = jax.random.PRNGKey(0)
    k_x, k_p = jax.random.split(key)

    # Small shapes; batch=8 so batch-stacking (BB=4, grid=(2,)) is exercised
    # while keeping >= 2 grid steps for v7x megacore.
    B, C, H, W = 8, 4, 16, 16
    x = jax.random.normal(k_x, (B, C, H, W), jnp.float32)             # NCHW input
    params = make_params(k_p, c_in=C, c_conv=8, num_ftrs=32, hidden=100)
    kparams = prepare_kernel_params(params, H=H, W=W)                 # one-time prep

    fwd = jax.jit(functools.partial(bounding_box_cnn_forward, kparams=kparams))
    out = jax.block_until_ready(fwd(x))

    assert out.shape == (B, 4), out.shape
    assert bool(jnp.all(jnp.isfinite(out)))
    ref = reference_forward(x, params)
    # Conv operands are bf16 (perf-review change), so tolerance is loosened from
    # the all-f32 1e-3; observed error is ~1e-4 at these shapes.
    assert bool(jnp.allclose(out, ref, rtol=2e-2, atol=2e-3)), (out, ref)
    print("KERNEL_OK")
</pallas_src>

<mosaic_0001>
module attributes {stable_mosaic.version = 11 : i64} {
  func.func @_fused_bbox_kernel(%arg0: i32, %arg1: memref<4x16x384xbf16, #tpu.memory_space<vmem>>, %arg2: memref<384x128xbf16, #tpu.memory_space<vmem>>, %arg3: memref<1x128xf32, #tpu.memory_space<vmem>>, %arg4: memref<128x128xf32, #tpu.memory_space<vmem>>, %arg5: memref<1x128xf32, #tpu.memory_space<vmem>>, %arg6: memref<128x128xf32, #tpu.memory_space<vmem>>, %arg7: memref<1x128xf32, #tpu.memory_space<vmem>>, %arg8: memref<128x128xf32, #tpu.memory_space<vmem>>, %arg9: memref<1x128xf32, #tpu.memory_space<vmem>>, %arg10: memref<1x4x128xf32, #tpu.memory_space<vmem>>) attributes {dimension_semantics = [#tpu.dimension_semantics<parallel>], iteration_bounds = array<i64: 2>, scalar_prefetch = 0 : i64, scratch_operands = 0 : i64, tpu.core_type = #tpu.core_type<tc>, window_params = [{transform_indices = @transform_0, window_bounds = array<i64: 4, 16, 384>}, {pipeline_mode = #tpu.pipeline_mode<synchronous>, transform_indices = @transform_1, window_bounds = array<i64: 384, 128>}, {pipeline_mode = #tpu.pipeline_mode<synchronous>, transform_indices = @transform_2, window_bounds = array<i64: 1, 128>}, {pipeline_mode = #tpu.pipeline_mode<synchronous>, transform_indices = @transform_3, window_bounds = array<i64: 128, 128>}, {pipeline_mode = #tpu.pipeline_mode<synchronous>, transform_indices = @transform_4, window_bounds = array<i64: 1, 128>}, {pipeline_mode = #tpu.pipeline_mode<synchronous>, transform_indices = @transform_5, window_bounds = array<i64: 128, 128>}, {pipeline_mode = #tpu.pipeline_mode<synchronous>, transform_indices = @transform_6, window_bounds = array<i64: 1, 128>}, {pipeline_mode = #tpu.pipeline_mode<synchronous>, transform_indices = @transform_7, window_bounds = array<i64: 128, 128>}, {pipeline_mode = #tpu.pipeline_mode<synchronous>, transform_indices = @transform_8, window_bounds = array<i64: 1, 128>}, {transform_indices = @transform_9, window_bounds = array<i64: 1, 4, 128>}]} {
    %c0 = arith.constant 0 : index
    %c0_0 = arith.constant 0 : index
    %c0_1 = arith.constant 0 : index
    %0 = vector.load %arg1[%c0, %c0_0, %c0_1] : memref<4x16x384xbf16, #tpu.memory_space<vmem>>, vector<4x16x384xbf16>
    %1 = vector.shape_cast %0 : vector<4x16x384xbf16> to vector<64x384xbf16>
    %c0_2 = arith.constant 0 : index
    %c0_3 = arith.constant 0 : index
    %2 = vector.load %arg2[%c0_2, %c0_3] : memref<384x128xbf16, #tpu.memory_space<vmem>>, vector<384x128xbf16>
    %cst = arith.constant dense<0.000000e+00> : vector<64x128xf32>
    %3 = tpu.matmul %1, %2, %cst {dimension_numbers = #tpu.dot_dimension_numbers<[1], [0], [0], [1], [0, 0, 1, 1], [], []>} : vector<64x384xbf16>, vector<384x128xbf16>, vector<64x128xf32> -> vector<64x128xf32>
    %c0_4 = arith.constant 0 : index
    %c0_5 = arith.constant 0 : index
    %4 = vector.load %arg3[%c0_4, %c0_5] : memref<1x128xf32, #tpu.memory_space<vmem>>, vector<1x128xf32>
    %5 = vector.broadcast %4 : vector<1x128xf32> to vector<64x128xf32>
    %6 = arith.addf %3, %5 : vector<64x128xf32>
    %cst_6 = arith.constant 0.000000e+00 : f32
    %7 = vector.broadcast %cst_6 : f32 to vector<64x128xf32>
    %8 = arith.maximumf %6, %7 : vector<64x128xf32>
    %9 = vector.shape_cast %8 : vector<64x128xf32> to vector<4x16x128xf32>
    %cst_7 = arith.constant dense<0.000000e+00> : vector<4x128xf32>
    %10 = vector.multi_reduction <add>, %9, %cst_7 [1] : vector<4x16x128xf32> to vector<4x128xf32>
    %c0_8 = arith.constant 0 : index
    %c0_9 = arith.constant 0 : index
    %11 = vector.load %arg4[%c0_8, %c0_9] : memref<128x128xf32, #tpu.memory_space<vmem>>, vector<128x128xf32>
    %cst_10 = arith.constant dense<0.000000e+00> : vector<4x128xf32>
    %12 = tpu.matmul %10, %11, %cst_10 {dimension_numbers = #tpu.dot_dimension_numbers<[1], [0], [0], [1], [0, 0, 1, 1], [], []>} : vector<4x128xf32>, vector<128x128xf32>, vector<4x128xf32> -> vector<4x128xf32>
    %c0_11 = arith.constant 0 : index
    %c0_12 = arith.constant 0 : index
    %13 = vector.load %arg5[%c0_11, %c0_12] : memref<1x128xf32, #tpu.memory_space<vmem>>, vector<1x128xf32>
    %14 = vector.broadcast %13 : vector<1x128xf32> to vector<4x128xf32>
    %15 = arith.addf %12, %14 : vector<4x128xf32>
    %c0_13 = arith.constant 0 : index
    %c0_14 = arith.constant 0 : index
    %16 = vector.load %arg6[%c0_13, %c0_14] : memref<128x128xf32, #tpu.memory_space<vmem>>, vector<128x128xf32>
    %cst_15 = arith.constant dense<0.000000e+00> : vector<4x128xf32>
    %17 = tpu.matmul %15, %16, %cst_15 {dimension_numbers = #tpu.dot_dimension_numbers<[1], [0], [0], [1], [0, 0, 1, 1], [], []>} : vector<4x128xf32>, vector<128x128xf32>, vector<4x128xf32> -> vector<4x128xf32>
    %c0_16 = arith.constant 0 : index
    %c0_17 = arith.constant 0 : index
    %18 = vector.load %arg7[%c0_16, %c0_17] : memref<1x128xf32, #tpu.memory_space<vmem>>, vector<1x128xf32>
    %19 = vector.broadcast %18 : vector<1x128xf32> to vector<4x128xf32>
    %20 = arith.addf %17, %19 : vector<4x128xf32>
    %cst_18 = arith.constant 0.000000e+00 : f32
    %21 = vector.broadcast %cst_18 : f32 to vector<4x128xf32>
    %22 = arith.maximumf %20, %21 : vector<4x128xf32>
    %c0_19 = arith.constant 0 : index
    %c0_20 = arith.constant 0 : index
    %23 = vector.load %arg8[%c0_19, %c0_20] : memref<128x128xf32, #tpu.memory_space<vmem>>, vector<128x128xf32>
    %cst_21 = arith.constant dense<0.000000e+00> : vector<4x128xf32>
    %24 = tpu.matmul %22, %23, %cst_21 {dimension_numbers = #tpu.dot_dimension_numbers<[1], [0], [0], [1], [0, 0, 1, 1], [], []>} : vector<4x128xf32>, vector<128x128xf32>, vector<4x128xf32> -> vector<4x128xf32>
    %c0_22 = arith.constant 0 : index
    %c0_23 = arith.constant 0 : index
    %25 = vector.load %arg9[%c0_22, %c0_23] : memref<1x128xf32, #tpu.memory_space<vmem>>, vector<1x128xf32>
    %26 = vector.broadcast %25 : vector<1x128xf32> to vector<4x128xf32>
    %27 = arith.addf %24, %26 : vector<4x128xf32>
    %c0_24 = arith.constant 0 : index
    %c0_25 = arith.constant 0 : index
    %c0_26 = arith.constant 0 : index
    %28 = vector.load %arg10[%c0_24, %c0_25, %c0_26] : memref<1x4x128xf32, #tpu.memory_space<vmem>>, vector<1x4x128xf32>
    %29 = vector.shape_cast %28 : vector<1x4x128xf32> to vector<4x128xf32>
    %30 = vector.shape_cast %27 : vector<4x128xf32> to vector<1x4x128xf32>
    tpu.vector_store %arg10[%c0_24, %c0_25, %c0_26], %30 {strides = array<i32>} : memref<1x4x128xf32, #tpu.memory_space<vmem>>, vector<1x4x128xf32>,
    return
  }
  func.func @transform_0(%arg0: i32) -> (i32, i32, i32) {
    %c0_i32 = arith.constant 0 : i32
    %c0_i32_0 = arith.constant 0 : i32
    %c0_i32_1 = arith.constant 0 : i32
    return %arg0, %c0_i32, %c0_i32_0 : i32, i32, i32
  }
  func.func @transform_1(%arg0: i32) -> (i32, i32) {
    %c0_i32 = arith.constant 0 : i32
    %c0_i32_0 = arith.constant 0 : i32
    %c0_i32_1 = arith.constant 0 : i32
    return %c0_i32, %c0_i32_0 : i32, i32
  }
  func.func @transform_2(%arg0: i32) -> (i32, i32) {
    %c0_i32 = arith.constant 0 : i32
    %c0_i32_0 = arith.constant 0 : i32
    %c0_i32_1 = arith.constant 0 : i32
    return %c0_i32, %c0_i32_0 : i32, i32
  }
  func.func @transform_3(%arg0: i32) -> (i32, i32) {
    %c0_i32 = arith.constant 0 : i32
    %c0_i32_0 = arith.constant 0 : i32
    %c0_i32_1 = arith.constant 0 : i32
    return %c0_i32, %c0_i32_0 : i32, i32
  }
  func.func @transform_4(%arg0: i32) -> (i32, i32) {
    %c0_i32 = arith.constant 0 : i32
    %c0_i32_0 = arith.constant 0 : i32
    %c0_i32_1 = arith.constant 0 : i32
    return %c0_i32, %c0_i32_0 : i32, i32
  }
  func.func @transform_5(%arg0: i32) -> (i32, i32) {
    %c0_i32 = arith.constant 0 : i32
    %c0_i32_0 = arith.constant 0 : i32
    %c0_i32_1 = arith.constant 0 : i32
    return %c0_i32, %c0_i32_0 : i32, i32
  }
  func.func @transform_6(%arg0: i32) -> (i32, i32) {
    %c0_i32 = arith.constant 0 : i32
    %c0_i32_0 = arith.constant 0 : i32
    %c0_i32_1 = arith.constant 0 : i32
    return %c0_i32, %c0_i32_0 : i32, i32
  }
  func.func @transform_7(%arg0: i32) -> (i32, i32) {
    %c0_i32 = arith.constant 0 : i32
    %c0_i32_0 = arith.constant 0 : i32
    %c0_i32_1 = arith.constant 0 : i32
    return %c0_i32, %c0_i32_0 : i32, i32
  }
  func.func @transform_8(%arg0: i32) -> (i32, i32) {
    %c0_i32 = arith.constant 0 : i32
    %c0_i32_0 = arith.constant 0 : i32
    %c0_i32_1 = arith.constant 0 : i32
    return %c0_i32, %c0_i32_0 : i32, i32
  }
  func.func @transform_9(%arg0: i32) -> (i32, i32, i32) {
    %c0_i32 = arith.constant 0 : i32
    %c0_i32_0 = arith.constant 0 : i32
    %c0_i32_1 = arith.constant 0 : i32
    return %arg0, %c0_i32, %c0_i32_0 : i32, i32, i32
  }
}

</mosaic_0001>

<bundles_post_ra>
// kernel: bounding_box_cnn_forward.1
= control target key start
LH: loop header
LB: loop body
LE: loop exit
PB: predicated region body
PF: predicated region fallthrough
CT: control target
= control target key end

     0   :  { %s1594_s30 = smov 0   ;;  %s1898_s0 = inlined_call_operand.vmem [shape: bf16[8,16,384], index: 0, kind: input, shape index: {}]   ;;  %s1899_s1 = inlined_call_operand.vmem [shape: bf16[384,128], index: 1, kind: input, shape index: {}]   ;;  %s1900_s2 = inlined_call_operand.vmem [shape: f32[1,128], index: 2, kind: input, shape index: {}]   ;;  %s1901_s3 = inlined_call_operand.vmem [shape: f32[128,128], index: 3, kind: input, shape index: {}]   ;;  %s1902_s4 = inlined_call_operand.vmem [shape: f32[1,128], index: 4, kind: input, shape index: {}]   ;;  %s1903_s5 = inlined_call_operand.vmem [shape: f32[128,128], index: 5, kind: input, shape index: {}]   ;;  %s1904_s6 = inlined_call_operand.vmem [shape: f32[1,128], index: 6, kind: input, shape index: {}, may-alias: {6,8}]   ;;  %s1905_s7 = inlined_call_operand.vmem [shape: f32[128,128], index: 7, kind: input, shape index: {}]   ;;  %s1906_s8 = inlined_call_operand.vmem [shape: f32[1,128], index: 8, kind: input, shape index: {}, may-alias: {6,8}]   ;;  %s1907_s9 = inlined_call_operand.vmem [shape: f32[2,4,128], index: 9, kind: output, shape index: {}]  }
   0x1 LB: > { %s1600_s10 = sadd.s32 4294967295, %s1539_s30   ;;  %p1131_p0 = scmp.ge.s32.totalorder %s1539_s30, 1  ;;  %s1539_s30 = sphi %s1594_s30, %s19_s30  }
   0x2   : > { %p289_p1 = scmp.lt.s32.totalorder %s1539_s30, 3 }
   0x4   : > { %p290_p2 = pnand %p1131_p0, %p289_p1 }
   0x5   : > { %v1493_v0 = vld [vmem:[%s1899_s1 + $0x40] sm:$0xff] (!%p290_p2)   ;;  %v1495_v2 = vld [vmem:[%s1899_s1 + $0x48] sm:$0xff] (!%p290_p2)   ;;  %v1498_v5 = vld [vmem:[%s1899_s1 + $0x50] sm:$0xff] (!%p290_p2)   ;;  %s1132_s25 = sshll.u32 (!%p290_p2), %s1600_s10, 2  ;;  %v1541_v39 = vmov (!%p290_p2), 0.0|0.0   ;;  %vm1542_vm0 = vmmov (!%p290_p2), 0  }
   0x6   : > { %293 = sbr.rel (%p290_p2) target bundleno = 945 (0x3b1), region = 56  ;;  %v1494_v1 = vld [vmem:[%s1899_s1] sm:$0xff] (!%p290_p2)   ;;  %1177 = vmatprep.subr.bf16.mxu0 (!%p290_p2), %v1493_v0  ;;  %v1497_v4 = vld [vmem:[%s1899_s1 + $0x8] sm:$0xff] (!%p290_p2)   ;;  %v1500_v7 = vld [vmem:[%s1899_s1 + $0x10] sm:$0xff] (!%p290_p2)   ;;  %p326_p3 = scmp.lt.s32.totalorder (!%p290_p2), %s1132_s25, 7  ;;  %v1543_v61 = vmov (!%p290_p2), 0.0  }
   0x7   : > { %1178 = vmatpush3.bf16.msra.mxu0 (!%p290_p2), %v1494_v1  ;;  %v1496_v3 = vld [vmem:[%s1899_s1 + $0x80] sm:$0xff] (!%p290_p2)   ;;  %v1499_v6 = vld [vmem:[%s1899_s1 + $0x88] sm:$0xff] (!%p290_p2)   ;;  %v1501_v8 = vld [vmem:[%s1899_s1 + $0x58] sm:$0xff] (!%p290_p2)   ;;  %vm809_vm1 = vcmask (!%p290_p2), 1041409   ;;  %vm811_vm2 = vcmask (!%p290_p2), 1042434   ;;  %vm813_vm3 = vcmask (!%p290_p2), 1043459  }
   0x8   : > { %1179 = vmatprep.subr.bf16.mxu0 (!%p290_p2), %v1495_v2  ;;  %1280 = vmatprep.subr.bf16.mxu1 (!%p290_p2), %v1496_v3  ;;  %v1502_v9 = vld [vmem:[%s1899_s1 + $0x90] sm:$0xff] (!%p290_p2)   ;;  %v1503_v10 = vld [vmem:[%s1899_s1 + $0x18] sm:$0xff] (!%p290_p2)   ;;  %v1504_v11 = vld [vmem:[%s1899_s1 + $0x60] sm:$0xff] (!%p290_p2)   ;;  %p332_p4 = scmp.lt.s32.totalorder (!%p290_p2), %s1600_s10, 1 }
   0x9   : > { %1281 = vmatpush3.bf16.msra.mxu1 (!%p290_p2), %v1496_v3  ;;  %v1505_v12 = vld [vmem:[%s1899_s1 + $0x98] sm:$0xff] (!%p290_p2)   ;;  %v1506_v13 = vld [vmem:[%s1899_s1 + $0x20] sm:$0xff] (!%p290_p2)   ;;  %v1507_v15 = vld [vmem:[%s1899_s1 + $0x68] sm:$0xff] (!%p290_p2)  }
   0xa   : > { %1282 = vmatprep.subr.bf16.mxu1 (!%p290_p2), %v1499_v6  ;;  %v1508_v14 = vld [vmem:[%s1899_s1 + $0xa0] sm:$0xff] (!%p290_p2)   ;;  %v1509_v16 = vld [vmem:[%s1899_s1 + $0x28] sm:$0xff] (!%p290_p2)   ;;  %v1510_v18 = vld [vmem:[%s1899_s1 + $0x70] sm:$0xff] (!%p290_p2)  }
   0xb   : > { %1180 = vmatpush3.bf16.msra.mxu0 (!%p290_p2), %v1497_v4  ;;  %v1511_v17 = vld [vmem:[%s1899_s1 + $0xa8] sm:$0xff] (!%p290_p2)   ;;  %v1512_v19 = vld [vmem:[%s1899_s1 + $0x30] sm:$0xff] (!%p290_p2)   ;;  %v1513_v20 = vld [vmem:[%s1899_s1 + $0x78] sm:$0xff] (!%p290_p2)  }
   0xc   : > { %1181 = vmatprep.subr.bf16.mxu0 (!%p290_p2), %v1498_v5  ;;  %v1514_v21 = vld [vmem:[%s1899_s1 + $0xb0] sm:$0xff] (!%p290_p2)   ;;  %v1515_v23 = vld [vmem:[%s1899_s1 + $0x38] sm:$0xff] (!%p290_p2)   ;;  %v782_v36 = vld [vmem:[%s1901_s3] sm:$0xff] (!%p290_p2) }
   0xd   : > { %1283 = vmatpush3.bf16.msra.mxu1 %v1499_v6  ;;  %s1909_s25 = smov (!%p326_p3, %s1132_s25), 7  ;;  %v1519_v25 = vld [vmem:[%s1899_s1 + $0xb8] sm:$0xff]   ;;  %v783_v37 = vld [vmem:[%s1901_s3 + $0x8] sm:$0xff]  ;;  %v784_v40 = vld [vmem:[%s1901_s3 + $0x10] sm:$0xff]  ;;  %s1911_s10 = smov (!%p332_p4, %s1600_s10), 1 }
   0xe   : > { %1284 = vmatprep.subr.bf16.mxu1 %v1502_v9  ;;  %s1481_s26 = smul.u32 24, %s1909_s25  ;;  %v1410_v38 = vpack.c.bf16 %v783_v37, %v782_v36  ;;  %v785_v41 = vld [vmem:[%s1901_s3 + $0x18] sm:$0xff]  ;;  %v786_v43 = vld [vmem:[%s1901_s3 + $0x20] sm:$0xff]  ;;  %v787_v44 = vld [vmem:[%s1901_s3 + $0x28] sm:$0xff]  ;;  %s1134_s15 = sshll.u32 %s1911_s10, 2 }
   0xf   : > { %1182 = vmatpush3.bf16.msra.mxu0 %v1500_v7  ;;  %v1413_v42 = vpack.c.bf16 %v785_v41, %v784_v40  ;;  %v1416_v45 = vpack.c.bf16 %v787_v44, %v786_v43  ;;  %v788_v46 = vld [vmem:[%s1901_s3 + $0x30] sm:$0xff]  ;;  %v789_v47 = vld [vmem:[%s1901_s3 + $0x38] sm:$0xff]  ;;  %v790_v49 = vld [vmem:[%s1901_s3 + $0x40] sm:$0xff]  ;;  %s335_s19 = scalar_lea.vmem %s1907_s9, %s1134_s15 }
  0x10   : > { %1183 = vmatprep.subr.bf16.mxu0 %v1501_v8  ;;  %s1668_s17 = scalar_lea.vmem %s1898_s0, %s1481_s26  ;;  %v1419_v48 = vpack.c.bf16 %v789_v47, %v788_v46  ;;  %v791_v50 = vld [vmem:[%s1901_s3 + $0x48] sm:$0xff]  ;;  %v792_v52 = vld [vmem:[%s1901_s3 + $0x50] sm:$0xff]  ;;  %v793_v53 = vld [vmem:[%s1901_s3 + $0x58] sm:$0xff] }
  0x11   : > { %1285 = vmatpush3.bf16.msra.mxu1 %v1502_v9  ;;  %v1518_v22 = vld [vmem:[%s1668_s17 + $0x4] ss:$12 sps:$4 sm:$0xff]   ;;  %v1520_v24 = vld [vmem:[%s1668_s17 + $0x8] ss:$12 sps:$4 sm:$0xff]   ;;  %v1516_v26 = vld [vmem:[%s1668_s17] ss:$12 sps:$4 sm:$0xff]   ;;  %v1422_v51 = vpack.c.bf16 %v791_v50, %v790_v49  ;;  %v1425_v54 = vpack.c.bf16 %v793_v53, %v792_v52 }
  0x12   : > { %1286 = vmatprep.subr.bf16.mxu1 %v1505_v12  ;;  %648 = vmatprep.mubr.bf16.mxu0 %v1518_v22  ;;  %v1522_v27 = vld [vmem:[%s1668_s17 + $0x1c] ss:$12 sps:$4 sm:$0xff]   ;;  %v1521_v28 = vld [vmem:[%s1668_s17 + $0x20] ss:$12 sps:$4 sm:$0xff]   ;;  %v1528_v29 = vld [vmem:[%s1668_s17 + $0x38] ss:$12 sps:$4 sm:$0xff]  }
  0x13   : > { %1184 = vmatpush3.bf16.msra.mxu0 %v1503_v10  ;;  %1296 = vmatprep.mubr.bf16.mxu1 %v1520_v24  ;;  %v1524_v30 = vld [vmem:[%s1668_s17 + $0x18] ss:$12 sps:$4 sm:$0xff]   ;;  %v1525_v31 = vld [vmem:[%s1668_s17 + $0x34] ss:$12 sps:$4 sm:$0xff]   ;;  %v1529_v32 = vld [vmem:[%s1668_s17 + $0x50] ss:$12 sps:$4 sm:$0xff]  }
  0x14   : > { %1185 = vmatprep.subr.bf16.mxu0 %v1504_v11  ;;  %v1527_v33 = vld [vmem:[%s1668_s17 + $0x30] ss:$12 sps:$4 sm:$0xff]   ;;  %v1530_v34 = vld [vmem:[%s1668_s17 + $0x4c] ss:$12 sps:$4 sm:$0xff]   ;;  %v1532_v35 = vld [vmem:[%s1668_s17 + $0x48] ss:$12 sps:$4 sm:$0xff]  }
  0x15   : > { %1287 = vmatpush3.bf16.msra.mxu1 %v1505_v12  ;;  %v794_v55 = vld [vmem:[%s1901_s3 + $0x60] sm:$0xff]  ;;  %v795_v56 = vld [vmem:[%s1901_s3 + $0x68] sm:$0xff]  ;;  %v796_v58 = vld [vmem:[%s1901_s3 + $0x70] sm:$0xff] }
  0x16   : > { %1288 = vmatprep.subr.bf16.mxu1 %v1508_v14  ;;  %v1428_v57 = vpack.c.bf16 %v795_v56, %v794_v55  ;;  %v797_v59 = vld [vmem:[%s1901_s3 + $0x78] sm:$0xff]  ;;  %v886_v62 = vld [vmem:[%s1903_s5] sm:$0xff]  ;;  %v887_v63 = vld [vmem:[%s1903_s5 + $0x8] sm:$0xff] }
  0x17   : > { %1186 = vmatpush3.bf16.msra.mxu0 %v1506_v13  ;;  %v1431_v60 = vpack.c.bf16 %v797_v59, %v796_v58  ;;  %v888_v0 = vld [vmem:[%s1903_s5 + $0x10] sm:$0xff]  ;;  %v1434_v1 = vpack.c.bf16 %v887_v63, %v886_v62  ;;  %v889_v2 = vld [vmem:[%s1903_s5 + $0x18] sm:$0xff]  ;;  %v890_v4 = vld [vmem:[%s1903_s5 + $0x20] sm:$0xff] }
  0x18   : > { %1187 = vmatprep.subr.bf16.mxu0 %v1507_v15  ;;  %v1437_v3 = vpack.c.bf16 %v889_v2, %v888_v0  ;;  %v891_v5 = vld [vmem:[%s1903_s5 + $0x28] sm:$0xff]  ;;  %v892_v7 = vld [vmem:[%s1903_s5 + $0x30] sm:$0xff]  ;;  %v893_v8 = vld [vmem:[%s1903_s5 + $0x38] sm:$0xff] }
  0x19   : > { %1289 = vmatpush3.bf16.msra.mxu1 %v1508_v14  ;;  %v1440_v6 = vpack.c.bf16 %v891_v5, %v890_v4  ;;  %v1443_v9 = vpack.c.bf16 %v893_v8, %v892_v7  ;;  %v894_v10 = vld [vmem:[%s1903_s5 + $0x40] sm:$0xff]  ;;  %v895_v11 = vld [vmem:[%s1903_s5 + $0x48] sm:$0xff]  ;;  %v896_v13 = vld [vmem:[%s1903_s5 + $0x50] sm:$0xff] }
  0x1a   : > { %1290 = vmatprep.subr.bf16.mxu1 %v1511_v17  ;;  %v1446_v12 = vpack.c.bf16 %v895_v11, %v894_v10  ;;  %v897_v14 = vld [vmem:[%s1903_s5 + $0x58] sm:$0xff] }
  0x1b   : > { %1188 = vmatpush3.bf16.msra.mxu0 %v1509_v16  ;;  %v1449_v15 = vpack.c.bf16 %v897_v14, %v896_v13  ;;  %v898_v16 = vld [vmem:[%s1903_s5 + $0x60] sm:$0xff] }
  0x1c   : > { %1189 = vmatprep.subr.bf16.mxu0 %v1510_v18 }
  0x1d   : > { %1291 = vmatpush3.bf16.msra.mxu1 %v1511_v17  ;;  %v899_v17 = vld [vmem:[%s1903_s5 + $0x68] sm:$0xff] }
  0x1e   : > { %1292 = vmatprep.subr.bf16.mxu1 %v1514_v21  ;;  %v1452_v18 = vpack.c.bf16 %v899_v17, %v898_v16 }
  0x1f   : > { %1190 = vmatpush3.bf16.msra.mxu0 %v1512_v19 }
  0x20   : > { %1191 = vmatprep.subr.bf16.mxu0 %v1513_v20 }
  0x21   : > { %1293 = vmatpush3.bf16.msra.mxu1 %v1514_v21  ;;  %v1808_v21 = vld [vmem:[%s1900_s2] ss:$0 sm:$0xff] }
  0x22   : > { %1294 = vmatprep.subr.bf16.mxu1 %v1519_v25 }
  0x23   : > { %1192 = vmatpush3.bf16.msra.mxu0 %v1515_v23 }
  0x24   : > { %1409 = vmatprep.subr.bf16.mxu0 %v1541_v39 }
  0x25   : > { %1295 = vmatpush3.bf16.msra.mxu1 %v1519_v25 }
  0x26   : > { %649 = vmatmul.mubr.bf16.vlgmr.msra.gmra.mrb[0].mxu0 %v1516_v26  ;;  %1433 = vmatprep.subr.bf16.mxu1 %v1541_v39 }
  0x27   : > { %656 = vmatprep.mubr.bf16.mxu0 %v1522_v27  ;;  %1411 = vmatpush3.bf16.msra.mxu0 %v1410_v38 }
  0x28   : > { %1297 = vmatmul.mubr.bf16.vlgmr.msra.gmra.mrb[0].mxu1 %v1521_v28  ;;  %1412 = vmatprep.subr.bf16.mxu0 %v1541_v39 }
  0x29   : > { %1300 = vmatprep.mubr.bf16.mxu1 %v1528_v29  ;;  %1435 = vmatpush3.bf16.msra.mxu1 %v1434_v1 }
  0x2a   : > { %1436 = vmatprep.subr.bf16.mxu1 %v1541_v39 }
  0x2b   : > { %1414 = vmatpush3.bf16.msra.mxu0 %v1413_v42 }
  0x2c   : > { %1415 = vmatprep.subr.bf16.mxu0 %v1541_v39 }
  0x2d   : > { %1438 = vmatpush3.bf16.msra.mxu1 %v1437_v3 }
  0x2e   : > { %657 = vmatmul.mubr.bf16.gmra.mrb[4].mxu0 %v1524_v30  ;;  %1439 = vmatprep.subr.bf16.mxu1 %v1541_v39 }
  0x2f   : > { %664 = vmatprep.mubr.bf16.mxu0 %v1525_v31  ;;  %1417 = vmatpush3.bf16.msra.mxu0 %v1416_v45 }
  0x30   : > { %1301 = vmatmul.mubr.bf16.gmra.mrb[4].mxu1 %v1529_v32  ;;  %1418 = vmatprep.subr.bf16.mxu0 %v1541_v39 }
  0x31   : > { %1371 = vmatprep.mubr.msk.f32.mxu1 %vm1542_vm0, %v1543_v61  ;;  %1441 = vmatpush3.bf16.msra.mxu1 %v1440_v6 }
  0x32   : > { %1442 = vmatprep.subr.bf16.mxu1 %v1541_v39 }
  0x33   : > { %1420 = vmatpush3.bf16.msra.mxu0 %v1419_v48 }
  0x34   : > { %1421 = vmatprep.subr.bf16.mxu0 %v1541_v39 }
  0x35   : > { %1444 = vmatpush3.bf16.msra.mxu1 %v1443_v9 }
  0x36   : > { %665 = vmatmul.mubr.bf16.gmra.mrb[8].mxu0 %v1527_v33  ;;  %1445 = vmatprep.subr.bf16.mxu1 %v1541_v39 }
  0x37   : > { %672 = vmatprep.mubr.bf16.mxu0 %v1530_v34  ;;  %1423 = vmatpush3.bf16.msra.mxu0 %v1422_v51 }
  0x38   : > { %1424 = vmatprep.subr.bf16.mxu0 %v1541_v39 }
  0x39   : > { %1447 = vmatpush3.bf16.msra.mxu1 %v1446_v12 }
  0x3a   : > { %1448 = vmatprep.subr.bf16.mxu1 %v1541_v39 }
  0x3b   : > { %1426 = vmatpush3.bf16.msra.mxu0 %v1425_v54 }
  0x3c   : > { %1427 = vmatprep.subr.bf16.mxu0 %v1541_v39 }
  0x3d   : > { %1450 = vmatpush3.bf16.msra.mxu1 %v1449_v15 }
  0x3e   : > { %673 = vmatmul.mubr.bf16.gmra.mrb[12].mxu0 %v1532_v35  ;;  %1451 = vmatprep.subr.bf16.mxu1 %v1541_v39 }
  0x3f   : > { %1429 = vmatpush3.bf16.msra.mxu0 %v1428_v57  ;;  %1336 = vmatprep.mubr.msk.f32.mxu0 %vm1542_vm0, %v1543_v61 }
  0x40   : > { %1430 = vmatprep.subr.bf16.mxu0 %v1541_v39 }
  0x41   : > { %1453 = vmatpush3.bf16.msra.mxu1 %v1452_v18 }
  0x42   : > { %1454 = vmatprep.subr.bf16.mxu1 %v1541_v39 }
  0x43   : > { %1432 = vmatpush3.bf16.msra.mxu0 %v1431_v60 }
  0x44   : > { %1457 = vmatprep.subr.bf16.mxu0 %v1541_v39 }
  0xf9   : > { %v1193_v19 = vpop.f32.mrb[0].mxu0 }
  0xfa   : > { %v1194_v20 = vpop.f32.mrb[1].mxu0 }
  0xfb   : > { %v1195_v22 = vadd.f32 %v1194_v20, %v1193_v19  ;;  %v1196_v23 = vpop.f32.mrb[2].mxu0  ;;  %v1298_v25 = vpop.f32.mrb[0].mxu1 }
  0xfc   : > { %v1197_v24 = vpop.f32.mrb[3].mxu0  ;;  %v715_v28 = vpop.f32.mrb[1].mxu1 }
  0xfd   : > { %v1198_v26 = vadd.f32 %v1197_v24, %v1196_v23  ;;  %v651_v27 = vadd.f32 %v1195_v22, %v1808_v21  ;;  %v1299_v29 = vpop.f32.mrb[2].mxu1 }
  0xfe   : > { %v718_v32 = vpop.f32.mrb[3].mxu1 }
  0xff   : > { %v716_v30 = vadd.f32 %v715_v28, %v651_v27  ;;  %v654_v31 = vadd.f32 %v1198_v26, %v1808_v21 }
 0x101   : > { %v719_v33 = vadd.f32 %v718_v32, %v654_v31  ;;  %v1199_v34 = vpop.f32.mrb[4].mxu0  ;;  %v746_v36 = vmax.f32 %v716_v30, 0.0 }
 0x102   : > { %v1200_v35 = vpop.f32.mrb[5].mxu0 }
 0x103   : > { %v747_v37 = vmax.f32 %v719_v33, 0.0  ;;  %v1201_v38 = vadd.f32 %v1200_v35, %v1199_v34  ;;  %v1202_v40 = vpop.f32.mrb[6].mxu0  ;;  %v1302_v42 = vpop.f32.mrb[4].mxu1 }
 0x104   : > { %v1203_v41 = vpop.f32.mrb[7].mxu0  ;;  %v731_v46 = vpop.f32.mrb[5].mxu1 }
 0x105   : > { %v754_v43 = vadd.f32 %v747_v37, %v746_v36  ;;  %v659_v44 = vadd.f32 %v1201_v38, %v1808_v21  ;;  %v1204_v45 = vadd.f32 %v1203_v41, %v1202_v40  ;;  %v1303_v47 = vpop.f32.mrb[6].mxu1 }
 0x106   : > { %v734_v51 = vpop.f32.mrb[7].mxu1 }
 0x107   : > { %v755_v48 = vrot.slane %v754_v43, 4  ;;  %v724_v49 = vadd.f32 %v1298_v25, %v659_v44  ;;  %v662_v50 = vadd.f32 %v1204_v45, %v1808_v21 }
 0x109   : > { %v756_v52 = vadd.f32 %v755_v48, %v754_v43  ;;  %v727_v53 = vadd.f32 %v1299_v29, %v662_v50  ;;  %v1205_v54 = vpop.f32.mrb[8].mxu0  ;;  %v748_v56 = vmax.f32 %v724_v49, 0.0  ;;  %v980_v49 = vld [vmem:[%s1905_s7] sm:$0xff]  ;;  %v981_v50 = vld [vmem:[%s1905_s7 + $0x8] sm:$0xff] }
 0x10a   : > { %v1206_v55 = vpop.f32.mrb[9].mxu0 }
 0x10b   : > { %v749_v57 = vmax.f32 %v727_v53, 0.0  ;;  %v1207_v58 = vadd.f32 %v1206_v55, %v1205_v54  ;;  %v1208_v59 = vpop.f32.mrb[10].mxu0  ;;  %v757_v60 = vrot.slane %v756_v52, 2  ;;  %v984_v54 = vld [vmem:[%s1905_s7 + $0x20] sm:$0xff]  ;;  %v985_v55 = vld [vmem:[%s1905_s7 + $0x28] sm:$0xff] }
 0x10c   : > { %v1209_v62 = vpop.f32.mrb[11].mxu0 }
 0x10d   : > { %v761_v63 = vadd.f32 %v749_v57, %v748_v56  ;;  %v1210_v0 = vadd.f32 %v1209_v62, %v1208_v59  ;;  %v667_v1 = vadd.f32 %v1207_v58, %v1808_v21  ;;  %v758_v5 = vadd.f32 %v757_v60, %v756_v52  ;;  %v983_v52 = vld [vmem:[%s1905_s7 + $0x18] sm:$0xff]  ;;  %v986_v57 = vld [vmem:[%s1905_s7 + $0x30] sm:$0xff]  ;;  %v988_v60 = vld [vmem:[%s1905_s7 + $0x40] sm:$0xff] }
 0x10e   : > { %v1464_v56 = vpack.c.bf16 %v985_v55, %v984_v54  ;;  %v987_v58 = vld [vmem:[%s1905_s7 + $0x38] sm:$0xff]  ;;  %v989_v62 = vld [vmem:[%s1905_s7 + $0x48] sm:$0xff] }
 0x10f   : > { %v762_v2 = vrot.slane %v761_v63, 4  ;;  %v732_v3 = vadd.f32 %v731_v46, %v667_v1  ;;  %v670_v4 = vadd.f32 %v1210_v0, %v1808_v21  ;;  %v759_v15 = vrot.slane %v758_v5, 1  ;;  %v900_v46 = vld [vmem:[%s1903_s5 + $0x70] sm:$0xff]  ;;  %v991_v1 = vld [vmem:[%s1905_s7 + $0x58] sm:$0xff] }
 0x110   : > { %v1467_v59 = vpack.c.bf16 %v987_v58, %v986_v57  ;;  %v990_v0 = vld [vmem:[%s1905_s7 + $0x50] sm:$0xff] }
 0x111   : > { %v763_v6 = vadd.f32 %v762_v2, %v761_v63  ;;  %v735_v7 = vadd.f32 %v734_v51, %v670_v4  ;;  %v1211_v8 = vpop.f32.mrb[12].mxu0  ;;  %v750_v11 = vmax.f32 %v732_v3, 0.0  ;;  %v760_v26 = vadd.f32 %v759_v15, %v758_v5  ;;  %v992_v3 = vld [vmem:[%s1905_s7 + $0x60] sm:$0xff]  ;;  %v993_v4 = vld [vmem:[%s1905_s7 + $0x68] sm:$0xff] }
 0x112   : > { %v1212_v9 = vpop.f32.mrb[13].mxu0  ;;  %v1458_v51 = vpack.c.bf16 %v981_v50, %v980_v49  ;;  %v1470_v63 = vpack.c.bf16 %v989_v62, %v988_v60  ;;  %v1473_v2 = vpack.c.bf16 %v991_v1, %v990_v0  ;;  %v1476_v5 = vpack.c.bf16 %v993_v4, %v992_v3 }
 0x113   : > { %v764_v10 = vrot.slane %v763_v6, 2  ;;  %v751_v12 = vmax.f32 %v735_v7, 0.0  ;;  %v1213_v13 = vadd.f32 %v1212_v9, %v1211_v8  ;;  %v1214_v14 = vpop.f32.mrb[14].mxu0 }
 0x114   : > { %v1215_v16 = vpop.f32.mrb[15].mxu0 }
 0x115   : > { %v765_v17 = vadd.f32 %v764_v10, %v763_v6  ;;  %v768_v18 = vadd.f32 %v751_v12, %v750_v11  ;;  %v675_v19 = vadd.f32 %v1213_v13, %v1808_v21  ;;  %v1216_v20 = vadd.f32 %v1215_v16, %v1214_v14  ;;  %v1172_v6 = vld [vmem:[%s1902_s4] ss:$0 sm:$0xff]  ;;  %v994_v10 = vld [vmem:[%s1905_s7 + $0x70] sm:$0xff]  ;;  %v995_v11 = vld [vmem:[%s1905_s7 + $0x78] sm:$0xff] }
 0x116   : > { %v1479_v12 = vpack.c.bf16 %v995_v11, %v994_v10 }
 0x117   : > { %v766_v22 = vrot.slane %v765_v17, 1  ;;  %v769_v23 = vrot.slane %v768_v18, 4  ;;  %v740_v24 = vadd.f32 %v1302_v42, %v675_v19  ;;  %v678_v25 = vadd.f32 %v1216_v20, %v1808_v21 }
 0x119   : > { %v767_v27 = vadd.f32 %v766_v22, %v765_v17  ;;  %v770_v28 = vadd.f32 %v769_v23, %v768_v18  ;;  %v743_v29 = vadd.f32 %v1303_v47, %v678_v25  ;;  %v752_v31 = vmax.f32 %v740_v24, 0.0  ;;  %v901_v47 = vld [vmem:[%s1903_s5 + $0x78] sm:$0xff]  ;;  %v1174_v17 = vld [vmem:[%s1906_s8] ss:$0 sm:$0xff] }
 0x11a   : > { %v1455_v48 = vpack.c.bf16 %v901_v47, %v900_v46 }
 0x11b   : > { %v771_v30 = vrot.slane %v770_v28, 2  ;;  %v753_v32 = vmax.f32 %v743_v29, 0.0  ;;  %v810_v33 = vsel %vm809_vm1, %v767_v27, %v760_v26 }
 0x11c   : > { %1456 = vmatpush3.bf16.msra.mxu1 %v1455_v48 }
 0x11d   : > { %v772_v34 = vadd.f32 %v771_v30, %v770_v28  ;;  %v775_v35 = vadd.f32 %v753_v32, %v752_v31 }
 0x11f   : > { %v773_v36 = vrot.slane %v772_v34, 1  ;;  %v776_v37 = vrot.slane %v775_v35, 4 }
 0x121   : > { %v774_v38 = vadd.f32 %v773_v36, %v772_v34  ;;  %v777_v40 = vadd.f32 %v776_v37, %v775_v35 }
 0x123   : > { %v778_v41 = vrot.slane %v777_v40, 2  ;;  %v812_v42 = vsel %vm811_vm2, %v774_v38, %v810_v33 }
 0x125   : > { %v779_v43 = vadd.f32 %v778_v41, %v777_v40 }
 0x127   : > { %v780_v21 = vrot.slane %v779_v43, 1 }
 0x129   : > { %v781_v44 = vadd.f32 %v780_v21, %v779_v43 }
 0x12b   : > { %v814_v45 = vsel %vm813_vm3, %v781_v44, %v812_v42 }
 0x12c   : > { %1337 = vmatmul.mubr.f32.vlgmr.msra.gmra.mrb[16].mxu0 %v814_v45 }
 0x12d   : > { %1406 = vmatprep.mubr.msk.f32.mxu0 %vm1542_vm0, %v1543_v61  ;;  %v982_v61 = vld [vmem:[%s1905_s7 + $0x10] sm:$0xff]  ;;  %1459 = vmatpush3.bf16.msra.mxu0 %v1458_v51 }
 0x12e   : > { %v1461_v53 = vpack.c.bf16 %v983_v52, %v982_v61  ;;  %1460 = vmatprep.subr.bf16.mxu0 %v1541_v39 }
 0x131   : > { %1462 = vmatpush3.bf16.msra.mxu0 %v1461_v53 }
 0x132   : > { %1463 = vmatprep.subr.bf16.mxu0 %v1541_v39 }
 0x135   : > { %1465 = vmatpush3.bf16.msra.mxu0 %v1464_v56 }
 0x136   : > { %1466 = vmatprep.subr.bf16.mxu0 %v1541_v39 }
 0x139   : > { %1468 = vmatpush3.bf16.msra.mxu0 %v1467_v59 }
 0x13a   : > { %1469 = vmatprep.subr.bf16.mxu0 %v1541_v39 }
 0x13d   : > { %1471 = vmatpush3.bf16.msra.mxu0 %v1470_v63 }
 0x13e   : > { %1472 = vmatprep.subr.bf16.mxu0 %v1541_v39 }
 0x141   : > { %1474 = vmatpush3.bf16.msra.mxu0 %v1473_v2 }
 0x142   : > { %1475 = vmatprep.subr.bf16.mxu0 %v1541_v39 }
 0x145   : > { %1477 = vmatpush3.bf16.msra.mxu0 %v1476_v5 }
 0x146   : > { %1478 = vmatprep.subr.bf16.mxu0 %v1541_v39  ;;  %v1173_v39 = vld [vmem:[%s1904_s6] ss:$0 sm:$0xff] }
 0x149   : > { %1480 = vmatpush3.bf16.msra.mxu0 %v1479_v12 }
 0x1ff   : > { %v882_v7 = vpop.f32.mrb[16].mxu0 }
 0x200   : > { %v883_v8 = vadd.f32 %v1172_v6, %v882_v7  ;;  %v1338_v9 = vpop.f32.mrb[17].mxu0 }
 0x202   : > { %1372 = vmatmul.mubr.f32.vlgmr.msra.gmra.mrb[8].mxu1 %v883_v8 }
 0x2d5   : > { %v975_v13 = vpop.f32.mrb[8].mxu1 }
 0x2d6   : > { %v976_v14 = vadd.f32 %v1173_v39, %v975_v13  ;;  %v1373_v15 = vpop.f32.mrb[9].mxu1 }
 0x2d8   : > { %v979_v16 = vmax.f32 %v976_v14, 0.0 }
 0x2da   : > { %1407 = vmatmul.mubr.f32.vlgmr.msra.gmra.mrb[18].mxu0 %v979_v16 }
 0x3ad   : > { %v1069_v18 = vpop.f32.mrb[18].mxu0 }
 0x3ae   : > { %v1070_v19 = vadd.f32 %v1174_v17, %v1069_v18  ;;  %v1408_v20 = vpop.f32.mrb[19].mxu0 }
 0x3b0   : > { %1073 = vst [vmem:[%s335_s19] sm:$0xf] %v1070_v19 }
 0x3b1 PF: > { %s19_s30 = sadd.s32 1, %s1539_s30  }
 0x3b2   : > { %p16_p5 = scmp.ge.s32.totalorder %s19_s30, 4  }
 0x3b4   :  { %18 = sbr.rel (!%p16_p5) target bundleno = 1 (0x1), region = 86 }

</bundles_post_ra>
